<compile_context>
chip_gen: v6e
topology: v6e:2x2x1
jax: 0.10.0
libtpu: 0.0.40
codegen_flags: <defaults>
</compile_context>

<pallas_src>
import jax
import jax.numpy as jnp
from jax.experimental import pallas as pl
from jax.experimental.pallas import tpu as pltpu


def _round_up(a, b):
    return ((a + b - 1) // b) * b


def gmlpe_kernel(ac_ref, x_ref, o_ref):
    # ac_ref: (2, 2) f32 in SMEM.  Row 0 = A (per-channel scale),
    #                              Row 1 = C (per-channel bias).
    # x_ref:  (tm, C) f32 in VMEM  — batch mapped onto (sublane, lane).
    # o_ref:  (2, tm, C) f32 in VMEM — channel-major output block.
    x = x_ref[...]                                   # (tm, C), full vregs

    a0 = ac_ref[0, 0]
    a1 = ac_ref[0, 1]
    c0 = ac_ref[1, 0]
    c1 = ac_ref[1, 1]

    y0 = x * a0 + c0                                 # channel 0: plain affine
    y1 = x * a1 + c1                                 # channel 1: affine + softplus

    # Numerically-stable softplus matching torch.nn.Softplus (beta=1,
    # threshold=20).  exp/log1p run on the EUP slot; the min() keeps the
    # unselected branch finite (padded / out-of-bounds rows stay harmless).
    sp = jnp.where(y1 > 20.0, y1,
                   jnp.log1p(jnp.exp(jnp.minimum(y1, 20.0))))

    # One full-tile store per channel (no sublane-sparse masked stores).
    o_ref[0] = y0
    o_ref[1] = sp


def gmlpe_forward(x, params, *, lanes=512, max_block_rows=1024, min_grid=8,
                  channel_major=False):
    """x: (N, 1) (or (N,)) f32.  params: (w1,b1,w2,b2,w3,b3), w stored (in,out).

    Returns (N, 2) f32 matching the PyTorch module's forward
    (or (2, N) channel-major if channel_major=True).
    """
    w1, b1, w2, b2, w3, b3 = params
    x_flat = x.reshape(-1).astype(jnp.float32)       # free reshape of (N,1)
    n = x_flat.shape[0]

    # Collapse the activation-free MLP into one affine map (done once, in XLA).
    A = w1 @ w2 @ w3                                  # (1, 2)
    C_ = (b1 @ w2 + b2) @ w3 + b3                     # (1, 2)
    ac = jnp.concatenate([A, C_], axis=0).astype(jnp.float32)   # (2, 2)

    # ---- 2-D (rows, lanes) layout of the batch -----------------------------
    C = max(128, (lanes // 128) * 128)                # lane width, mult of 128
    r = _round_up(pl.cdiv(n, C), 8)                   # rows, mult of 8 sublanes
    n_pad = r * C                                     # tail pad < 8*C elements
    if n_pad != n:
        x_flat = jnp.pad(x_flat, (0, n_pad - n))      # small tail pad only
    x2d = x_flat.reshape(r, C)                        # free reshape

    # Row-block: multiple of 8, capped so (a) the double-buffered VMEM
    # footprint (~24 * tm * C bytes) stays within the default scoped VMEM on
    # all generations (v5e 16 MiB, v6e/v7x 32 MiB) and (b) the grid keeps at
    # least `min_grid` steps so v7x's two TensorCores both get work.
    tm = _round_up(pl.cdiv(r, min_grid), 8)
    tm = max(8, min(tm, max_block_rows, r))
    grid = pl.cdiv(r, tm)                             # edge blocks are clipped

    cost = pl.CostEstimate(
        flops=4 * n_pad,                              # 2 FMAs per row
        transcendentals=2 * n_pad,                    # exp + log1p per row
        bytes_accessed=12 * n_pad)                    # 4 B in + 8 B out

    out = pl.pallas_call(
        gmlpe_kernel,
        out_shape=jax.ShapeDtypeStruct((2, r, C), jnp.float32),
        grid=(grid,),
        in_specs=[
            # (2,2) A/C constant: resident in SMEM for the whole kernel.
            pl.BlockSpec(memory_space=pltpu.MemorySpace.SMEM),
            # x block: (tm, C) — batch on (sublane, lane), full vregs.
            pl.BlockSpec((tm, C), lambda i: (i, 0)),
        ],
        out_specs=pl.BlockSpec((2, tm, C), lambda i: (0, i, 0)),
        compiler_params=pltpu.CompilerParams(
            dimension_semantics=("parallel",)),
        cost_estimate=cost,
    )(ac, x2d)

    if channel_major:
        # Zero extra passes: hand the consumer the kernel's native layout.
        return out.reshape(2, -1)[:, :n]

    # Module-parity (N, 2) layout: one fused slice+stack pass in XLA.
    out0 = out[0].reshape(-1)[:n]
    out1 = out[1].reshape(-1)[:n]
    return jnp.stack([out0, out1], axis=-1)


def init_params(key):
    """Deterministic init mimicking PyTorch Linear default U(-1/sqrt(fan_in), +)."""
    ks = jax.random.split(key, 6)

    def lin(kw, kb, fan_in, fan_out):
        bound = 1.0 / jnp.sqrt(fan_in)
        w = jax.random.uniform(kw, (fan_in, fan_out), jnp.float32, -bound, bound)
        b = jax.random.uniform(kb, (1, fan_out), jnp.float32, -bound, bound)
        return w, b

    w1, b1 = lin(ks[0], ks[1], 1, 16)
    w2, b2 = lin(ks[2], ks[3], 16, 16)
    w3, b3 = lin(ks[4], ks[5], 16, 2)
    return (w1, b1, w2, b2, w3, b3)


def gmlpe_reference(x, params):
    """Layered reference (matches the PyTorch module, incl. softplus on col 1)."""
    w1, b1, w2, b2, w3, b3 = params
    h = x @ w1 + b1
    h = h @ w2 + b2
    y = h @ w3 + b3
    y1 = jnp.where(y[:, 1] > 20.0, y[:, 1],
                   jnp.log1p(jnp.exp(jnp.minimum(y[:, 1], 20.0))))
    return y.at[:, 1].set(y1)


if __name__ == "__main__":
    key = jax.random.PRNGKey(0)
    k_x, k_x2, k_x3, k_p = jax.random.split(key, 4)
    params = init_params(k_p)

    # 1) Small test consistent with the module (batch=8, in_features=1).
    x = jax.random.normal(k_x, (8, 1), dtype=jnp.float32)
    out = jax.block_until_ready(gmlpe_forward(x, params))
    ref = gmlpe_reference(x, params)
    assert out.shape == (8, 2)
    assert jnp.allclose(out, ref, atol=2e-5, rtol=1e-5), (
        float(jnp.max(jnp.abs(out - ref))))

    # 2) Multi-step grid + lane tail-pad path (r=16 rows, tm=8 -> grid=2).
    x2 = jax.random.normal(k_x2, (2000, 1), dtype=jnp.float32)
    out2 = jax.block_until_ready(
        gmlpe_forward(x2, params, lanes=128, max_block_rows=8))
    ref2 = gmlpe_reference(x2, params)
    assert out2.shape == (2000, 2)
    assert jnp.allclose(out2, ref2, atol=2e-5, rtol=1e-5), (
        float(jnp.max(jnp.abs(out2 - ref2))))

    # 3) Edge (partially out-of-bounds) row blocks: r=40 rows, tm=16 -> grid=3.
    x3 = jax.random.normal(k_x3, (5000, 1), dtype=jnp.float32)
    out3 = jax.block_until_ready(
        gmlpe_forward(x3, params, lanes=128, max_block_rows=16, min_grid=2))
    ref3 = gmlpe_reference(x3, params)
    assert out3.shape == (5000, 2)
    assert jnp.allclose(out3, ref3, atol=2e-5, rtol=1e-5), (
        float(jnp.max(jnp.abs(out3 - ref3))))

    # Channel-major fast path (no post-kernel interleave) is consistent too.
    cm = jax.block_until_ready(gmlpe_forward(x3, params, channel_major=True))
    assert cm.shape == (2, 5000)
    assert jnp.allclose(cm.T, ref3, atol=2e-5, rtol=1e-5)

    print("KERNEL_OK")
</pallas_src>

<mosaic_0001>
module attributes {stable_mosaic.version = 11 : i64} {
  func.func @gmlpe_kernel(%arg0: i32, %arg1: memref<2x2xf32, #tpu.memory_space<smem>>, %arg2: memref<8x512xf32, #tpu.memory_space<vmem>>, %arg3: memref<2x8x512xf32, #tpu.memory_space<vmem>>) attributes {dimension_semantics = [#tpu.dimension_semantics<parallel>], iteration_bounds = array<i64: 1>, scalar_prefetch = 0 : i64, scratch_operands = 0 : i64, tpu.core_type = #tpu.core_type<tc>, window_params = [{transform_indices = @transform_0, window_bounds = array<i64: 2, 2>}, {transform_indices = @transform_1, window_bounds = array<i64: 8, 512>}, {transform_indices = @transform_2, window_bounds = array<i64: 2, 8, 512>}]} {
    %c0 = arith.constant 0 : index
    %c0_0 = arith.constant 0 : index
    %0 = vector.load %arg2[%c0, %c0_0] : memref<8x512xf32, #tpu.memory_space<vmem>>, vector<8x512xf32>
    %c0_1 = arith.constant 0 : index
    %c0_2 = arith.constant 0 : index
    %1 = memref.load %arg1[%c0_1, %c0_2] : memref<2x2xf32, #tpu.memory_space<smem>>
    %c0_3 = arith.constant 0 : index
    %c1 = arith.constant 1 : index
    %2 = memref.load %arg1[%c0_3, %c1] : memref<2x2xf32, #tpu.memory_space<smem>>
    %c1_4 = arith.constant 1 : index
    %c0_5 = arith.constant 0 : index
    %3 = memref.load %arg1[%c1_4, %c0_5] : memref<2x2xf32, #tpu.memory_space<smem>>
    %c1_6 = arith.constant 1 : index
    %c1_7 = arith.constant 1 : index
    %4 = memref.load %arg1[%c1_6, %c1_7] : memref<2x2xf32, #tpu.memory_space<smem>>
    %5 = vector.broadcast %1 : f32 to vector<8x512xf32>
    %6 = arith.mulf %0, %5 : vector<8x512xf32>
    %7 = vector.broadcast %3 : f32 to vector<8x512xf32>
    %8 = arith.addf %6, %7 : vector<8x512xf32>
    %9 = vector.broadcast %2 : f32 to vector<8x512xf32>
    %10 = arith.mulf %0, %9 : vector<8x512xf32>
    %11 = vector.broadcast %4 : f32 to vector<8x512xf32>
    %12 = arith.addf %10, %11 : vector<8x512xf32>
    %cst = arith.constant 2.000000e+01 : f32
    %13 = vector.broadcast %cst : f32 to vector<8x512xf32>
    %14 = arith.cmpf ogt, %12, %13 : vector<8x512xf32>
    %cst_8 = arith.constant 2.000000e+01 : f32
    %15 = vector.broadcast %cst_8 : f32 to vector<8x512xf32>
    %16 = arith.minimumf %12, %15 : vector<8x512xf32>
    %17 = math.exp %16 : vector<8x512xf32>
    %18 = math.log1p %17 : vector<8x512xf32>
    %19 = arith.select %14, %12, %18 : vector<8x512xi1>, vector<8x512xf32>
    %c0_9 = arith.constant 0 : index
    %c0_10 = arith.constant 0 : index
    %c0_11 = arith.constant 0 : index
    %20 = vector.load %arg3[%c0_9, %c0_10, %c0_11] : memref<2x8x512xf32, #tpu.memory_space<vmem>>, vector<1x8x512xf32>
    %21 = vector.shape_cast %20 : vector<1x8x512xf32> to vector<8x512xf32>
    %22 = vector.shape_cast %8 : vector<8x512xf32> to vector<1x8x512xf32>
    tpu.vector_store %arg3[%c0_9, %c0_10, %c0_11], %22 {strides = array<i32>} : memref<2x8x512xf32, #tpu.memory_space<vmem>>, vector<1x8x512xf32>,
    %c1_12 = arith.constant 1 : index
    %c0_13 = arith.constant 0 : index
    %c0_14 = arith.constant 0 : index
    %23 = vector.load %arg3[%c1_12, %c0_13, %c0_14] : memref<2x8x512xf32, #tpu.memory_space<vmem>>, vector<1x8x512xf32>
    %24 = vector.shape_cast %23 : vector<1x8x512xf32> to vector<8x512xf32>
    %25 = vector.shape_cast %19 : vector<8x512xf32> to vector<1x8x512xf32>
    tpu.vector_store %arg3[%c1_12, %c0_13, %c0_14], %25 {strides = array<i32>} : memref<2x8x512xf32, #tpu.memory_space<vmem>>, vector<1x8x512xf32>,
    return
  }
  func.func @transform_0(%arg0: i32) -> (i32, i32) {
    %c0_i32 = arith.constant 0 : i32
    %c0_i32_0 = arith.constant 0 : i32
    %c0_i32_1 = arith.constant 0 : i32
    return %c0_i32, %c0_i32_0 : i32, i32
  }
  func.func @transform_1(%arg0: i32) -> (i32, i32) {
    %c0_i32 = arith.constant 0 : i32
    %c0_i32_0 = arith.constant 0 : i32
    return %arg0, %c0_i32 : i32, i32
  }
  func.func @transform_2(%arg0: i32) -> (i32, i32, i32) {
    %c0_i32 = arith.constant 0 : i32
    %c0_i32_0 = arith.constant 0 : i32
    %c0_i32_1 = arith.constant 0 : i32
    return %c0_i32, %arg0, %c0_i32_0 : i32, i32, i32
  }
}

</mosaic_0001>

<bundles_post_ra>
// kernel: tpu_custom_call.1
= control target key start
LH: loop header
LB: loop body
LE: loop exit
PB: predicated region body
PF: predicated region fallthrough
CT: control target
= control target key end

     0   :  { %7 = vsyncpa [#allocation5], 0  ;;  %s286_s0 = inlined_call_operand.hbm [shape: f32[2,2], index: 0, kind: input, shape index: {}]   ;;  %s287_s1 = inlined_call_operand.hbm [shape: f32[8,512], index: 1, kind: input, shape index: {}]   ;;  %s288_s2 = inlined_call_operand.hbm [shape: f32[2,8,512], index: 2, kind: output, shape index: {}]  }
   0x1   :  { %8 = vsyncpa [#allocation3], 0 }
   0x2   :  { %9 = vsyncpa [#allocation4], 0  ;;  %s224_s9 = smov [#allocation2]   ;;  %s225_s12 = smov [#allocation6]  }
   0x3   :  { %17 = dma.hbm_to_smem %s286_s0, 32, %s224_s9, [#allocation5]  }
   0x4   :  { %s24_s13 = sshll.u32 %s225_s12, 4  ;;  %s25_s13 = int_to_ptr.vmem [resolvable:$true] %s24_s13 }
   0x5   :  { %s186_s14 = scalar_lea.vmem %s25_s13, 512  ;;  %p191_p1 = scmp.lt.s32.totalorder %s25_s13, %s25_s13 }
   0x6   :  { %p187_p0 = scmp.ne.s32.totalorder %s25_s13, %s186_s14  ;;  %p192_p2 = scmp.lt.s32.totalorder %s186_s14, %s186_s14 }
   0x8   :  { %p193_p3 = por %p192_p2, %p191_p1 }
   0xa   :  { %p194_p4 = pnand %p193_p3, %p187_p0 }
   0xc   :  { %197 = shalt.err (!%p194_p4)
}
   0xd   :  { %27 = dma.hbm_to_vmem [thread:$0]  %s287_s1, 512, %s25_s13, [#allocation3]  }
   0xe   :  { %218 = dma.done.wait [#allocation5], 32  }
   0xf   :  { %219 = vsyncadd [#allocation5], 4294967264 }
  0x10   :  { %220 = dma.done.wait [#allocation3], 512  }
  0x11   :  { %221 = vsyncadd [#allocation3], 4294966784 }
  0x12   :  { %34 = sfence }
  0x13   :  { %s39_s0 = sld [smem:[#allocation2]]  ;;  %v35_v0 = vld [vmem:[#allocation6] sm:$0xff]  ;;  %v36_v1 = vld [vmem:[#allocation6 + $0x8] sm:$0xff]  ;;  %v37_v2 = vld [vmem:[#allocation6 + $0x10] sm:$0xff]  ;;  %s226_s1 = smov [#allocation7]  }
  0x14   :  { %s146_s17 = sld [smem:[#allocation2 + $0x1]]  ;;  %v38_v8 = vld [vmem:[#allocation6 + $0x18] sm:$0xff]  ;;  %s133_s20 = sshll.u32 %s226_s1, 4  ;;  %s134_s20 = int_to_ptr.vmem [resolvable:$true] %s133_s20 }
  0x15   :  { %s147_s18 = sld [smem:[#allocation2 + $0x80]]  ;;  %s198_s21 = scalar_lea.vmem %s134_s20, 1024 }
  0x16   :  { %s148_s19 = sld [smem:[#allocation2 + $0x81]]  ;;  %p199_p5 = scmp.ne.s32.totalorder %s134_s20, %s198_s21 }
  0x17   :  { %p203_p6 = scmp.lt.s32.totalorder %s134_s20, %s134_s20  ;;  %p204_p7 = scmp.lt.s32.totalorder %s198_s21, %s198_s21 }
  0x19   :  { %v43_v3 = vstv %s39_s0  ;;  %p205_p8 = por %p204_p7, %p203_p6 }
  0x1a   :  { %v44_v4 = vmul.f32 %v43_v3, %v35_v0  ;;  %v53_v5 = vstv %s146_s17  ;;  %v45_v6 = vmul.f32 %v43_v3, %v36_v1  ;;  %v46_v7 = vmul.f32 %v43_v3, %v37_v2 }
  0x1b   :  { %v48_v9 = vstv %s147_s18  ;;  %v54_v10 = vmul.f32 %v53_v5, %v35_v0  ;;  %v55_v11 = vmul.f32 %v53_v5, %v36_v1  ;;  %v56_v12 = vmul.f32 %v53_v5, %v37_v2  ;;  %p206_p9 = pnand %p205_p8, %p199_p5 }
  0x1c   :  { %v49_v13 = vadd.f32 %v48_v9, %v44_v4  ;;  %v50_v14 = vadd.f32 %v48_v9, %v45_v6  ;;  %v51_v15 = vadd.f32 %v48_v9, %v46_v7  ;;  %v47_v16 = vmul.f32 %v43_v3, %v38_v8 }
  0x1d   :  { %v57_v17 = vmul.f32 %v53_v5, %v38_v8  ;;  %v58_v18 = vstv %s148_s19 }
  0x1e   :  { %119 = vst [vmem:[#allocation7] sm:$0xff] %v49_v13  ;;  %120 = vst [vmem:[#allocation7 + $0x8] sm:$0xff] %v50_v14  ;;  %v52_v19 = vadd.f32 %v48_v9, %v47_v16  ;;  %v59_v20 = vadd.f32 %v58_v18, %v54_v10  ;;  %v250_v21 = vadd.f32 %v58_v18, %v55_v11 }
  0x1f   :  { %121 = vst [vmem:[#allocation7 + $0x10] sm:$0xff] %v51_v15  ;;  %v252_v22 = vadd.f32 %v58_v18, %v56_v12  ;;  %v254_v23 = vadd.f32 %v58_v18, %v57_v17 }
  0x20   :  { %122 = vst [vmem:[#allocation7 + $0x18] sm:$0xff] %v52_v19  ;;  %v67_v24 = vmin.f32 %v59_v20, 20.0  ;;  %v68_v25 = vmin.f32 %v250_v21, 20.0  ;;  %vm63_vm1 = vcmp.gt.f32.partialorder %v59_v20, 20.0  ;;  %vm64_vm3 = vcmp.gt.f32.partialorder %v250_v21, 20.0 }
  0x21   :  { %v69_v26 = vmin.f32 %v252_v22, 20.0  ;;  %v70_v27 = vmin.f32 %v254_v23, 20.0  ;;  %vm65_vm5 = vcmp.gt.f32.partialorder %v252_v22, 20.0  ;;  %vm66_vm7 = vcmp.gt.f32.partialorder %v254_v23, 20.0 }
  0x22   :  { %v71_v28 = vmul.f32 1.442695, %v67_v24  ;;  %v73_v29 = vmul.f32 1.442695, %v68_v25 }
  0x23   :  { %v75_v30 = vmul.f32 1.442695, %v69_v26  ;;  %v77_v31 = vmul.f32 1.442695, %v70_v27 }
  0x24   :  { %154 = vpow2.f32 %v71_v28 }
  0x25   :  { %156 = vpow2.f32 %v73_v29 }
  0x26   :  { %158 = vpow2.f32 %v75_v30 }
  0x27   :  { %160 = vpow2.f32 %v77_v31 }
  0x31   :  { %v155_v32 = vpop.eup %154 }
  0x32   :  { %v157_v33 = vpop.eup %156  ;;  %v79_v34 = vadd.f32 1.0, %v155_v32  ;;  %v82_v40 = vmul.f32 -0.5, %v155_v32  ;;  %v85_v45 = vand.u32 2147483647, %v155_v32 }
  0x33   :  { %v159_v35 = vpop.eup %158  ;;  %v88_v36 = vadd.f32 1.0, %v157_v33  ;;  %v91_v41 = vmul.f32 -0.5, %v157_v33  ;;  %v94_v47 = vand.u32 2147483647, %v157_v33 }
  0x34   :  { %v161_v37 = vpop.eup %160  ;;  %162 = vlog2.f32 %v79_v34  ;;  %v97_v38 = vadd.f32 1.0, %v159_v35  ;;  %v100_v42 = vmul.f32 -0.5, %v159_v35  ;;  %v83_v43 = vadd.f32 1.0, %v82_v40 }
  0x35   :  { %164 = vlog2.f32 %v88_v36  ;;  %v106_v39 = vadd.f32 1.0, %v161_v37  ;;  %v109_v44 = vmul.f32 -0.5, %v161_v37  ;;  %v92_v46 = vadd.f32 1.0, %v91_v41 }
  0x36   :  { %166 = vlog2.f32 %v97_v38  ;;  %v101_v48 = vadd.f32 1.0, %v100_v42  ;;  %v103_v49 = vand.u32 2147483647, %v159_v35  ;;  %v84_v50 = vmul.f32 %v155_v32, %v83_v43 }
  0x37   :  { %168 = vlog2.f32 %v106_v39  ;;  %v110_v51 = vadd.f32 1.0, %v109_v44  ;;  %vm259_vm0 = vcmp.lt.f32.partialorder %v85_v45, 0.0004427343  ;;  %v93_v54 = vmul.f32 %v157_v33, %v92_v46 }
  0x38   :  { %v112_v55 = vand.u32 2147483647, %v161_v37  ;;  %vm263_vm2 = vcmp.lt.f32.partialorder %v94_v47, 0.0004427343  ;;  %v102_v59 = vmul.f32 %v159_v35, %v101_v48  ;;  %vm268_vm4 = vcmp.lt.f32.partialorder %v103_v49, 0.0004427343 }
  0x39   :  { %v111_v1 = vmul.f32 %v161_v37, %v110_v51 }
  0x3a   :  { %vm113_vm6 = vcmp.lt.f32.partialorder %v112_v55, 0.0004427343 }
  0x41   :  { %v163_v52 = vpop.eup %162 }
  0x42   :  { %v165_v56 = vpop.eup %164  ;;  %v81_v57 = vmul.f32 0.6931472, %v163_v52 }
  0x43   :  { %v167_v60 = vpop.eup %166  ;;  %v90_v61 = vmul.f32 0.6931472, %v165_v56 }
  0x44   :  { %v87_v63 = vsel %vm259_vm0, %v84_v50, %v81_v57  ;;  %v99_v0 = vmul.f32 0.6931472, %v167_v60  ;;  %v169_v2 = vpop.eup %168 }
  0x45   :  { %v115_v3 = vsel %vm63_vm1, %v59_v20, %v87_v63  ;;  %v96_v4 = vsel %vm263_vm2, %v93_v54, %v90_v61  ;;  %v108_v7 = vmul.f32 0.6931472, %v169_v2 }
  0x46   :  { %124 = vst [vmem:[#allocation7 + $0x20] sm:$0xff] %v115_v3  ;;  %v116_v5 = vsel %vm64_vm3, %v250_v21, %v96_v4  ;;  %v105_v6 = vsel %vm268_vm4, %v102_v59, %v99_v0 }
  0x47   :  { %125 = vst [vmem:[#allocation7 + $0x28] sm:$0xff] %v116_v5  ;;  %v117_v8 = vsel %vm65_vm5, %v252_v22, %v105_v6  ;;  %v114_v9 = vsel %vm113_vm6, %v111_v1, %v108_v7 }
  0x48   :  { %126 = vst [vmem:[#allocation7 + $0x30] sm:$0xff] %v117_v8  ;;  %v118_v10 = vsel %vm66_vm7, %v254_v23, %v114_v9 }
  0x49   :  { %127 = vst [vmem:[#allocation7 + $0x38] sm:$0xff] %v118_v10 }
  0x4a   :  { %209 = shalt.err (!%p206_p9)
}
  0x4b   :  { %s227_s22 = smov 512   ;;  %s228_s23 = smov 32  }
  0x4c   :  { %139 = dma.vmem_to_hbm [thread:$0]  %s134_s20, 1024, %s288_s2, [#allocation4], %s227_s22, %s227_s22, %s228_s23  }
  0x4d   :  { %222 = dma.done.wait [#allocation4], 1024  }
  0x4e   :  { %223 = vsyncadd [#allocation4], 4294966272 }
  0x4f   :  { %143 = vsyncpa [#allocation3], 1 }
  0x50   :  { %144 = vsyncpa [#allocation4], 1 }
  0x51   :  { %145 = vsyncpa [#allocation5], 1 }

</bundles_post_ra>
